<compile_context>
chip_gen: v5e
topology: v5e:2x2
jax: 0.10.0
libtpu: 0.0.40
codegen_flags: <defaults>
</compile_context>

<pallas_src>
import functools

import jax
import jax.numpy as jnp
from jax.experimental import pallas as pl
from jax.experimental.pallas import tpu as pltpu


def bert_pooler_kernel(x_ref, w_ref, b_ref, o_ref, *, apply_norm):
    # x_ref: [B, H]       first-token activations (full block, same for every tile)
    # w_ref: [tn, H]      PyTorch Linear weight tile, [out_features, in_features]
    # b_ref: [1, tn]      bias tile
    # o_ref: [B, tn]      output tile
    x = x_ref[...]

    if apply_norm:
        # z_norm over the batch axis (axis 0), biased variance, eps = 1e-9.
        # Statistics in f32; feed the MXU operands in the native dtype.
        xf = x.astype(jnp.float32)
        mean = jnp.mean(xf, axis=0, keepdims=True)
        var = jnp.mean((xf - mean) ** 2, axis=0, keepdims=True)
        x = ((xf - mean) * jax.lax.rsqrt(var + 1e-9)).astype(x_ref.dtype)

    # nn.Linear: y = x @ W.T + b, contracting the in-features dim of both
    # operands directly (no transposed copy of the weight tile), f32 accumulate.
    y = jax.lax.dot_general(
        x,
        w_ref[...],
        dimension_numbers=(((1,), (1,)), ((), ())),
        preferred_element_type=jnp.float32,
    )
    y = y + b_ref[...].astype(jnp.float32)

    o_ref[...] = jnp.tanh(y).astype(o_ref.dtype)


def _pick_block_n(H, itemsize):
    """Output-feature tile size: single block when small, 128-multiples when big."""
    # Double-buffered weight block must stay well inside the v7x scoped VMEM
    # budget (32 MiB default / 64 MiB physical).
    if H * H * itemsize * 2 <= 16 * 1024 * 1024:
        return H
    for tn in (1024, 512, 256, 128):
        if H % tn == 0:
            return tn
    return H  # odd H: fall back to a single block


def bert_pooler(hidden_states, weight, bias, is_norm, *, block_n=None):
    """hidden_states: [B, S, H]; weight: [H, H] ([out, in]); bias: [H]; is_norm: bool."""
    B, S, H = hidden_states.shape
    first_token = hidden_states[:, 0, :]  # [B, H] glue slice
    bias2d = bias.reshape(1, H)

    if block_n is None:
        block_n = _pick_block_n(H, weight.dtype.itemsize)
    assert H % block_n == 0
    n_tiles = H // block_n

    kernel = functools.partial(bert_pooler_kernel, apply_norm=bool(is_norm))

    return pl.pallas_call(
        kernel,
        out_shape=jax.ShapeDtypeStruct((B, H), hidden_states.dtype),
        grid=(n_tiles,),
        in_specs=[
            pl.BlockSpec((B, H), lambda j: (0, 0)),          # x: full block every tile
            pl.BlockSpec((block_n, H), lambda j: (j, 0)),    # weight tile [tn, H]
            pl.BlockSpec((1, block_n), lambda j: (0, j)),    # bias tile
        ],
        out_specs=pl.BlockSpec((B, block_n), lambda j: (0, j)),
        compiler_params=pltpu.CompilerParams(
            dimension_semantics=("parallel",),  # N tiles are independent
        ),
    )(first_token, weight, bias2d)


def bert_pooler_ref(hidden_states, weight, bias, is_norm):
    """Pure-JAX reference mirroring the PyTorch module."""
    x = hidden_states[:, 0, :]
    if is_norm:
        mean = jnp.mean(x, axis=0, keepdims=True)
        var = jnp.mean((x - mean) ** 2, axis=0, keepdims=True)
        x = (x - mean) / jnp.sqrt(var + 1e-9)
    y = x @ weight.T + bias
    return jnp.tanh(y)


if __name__ == "__main__":
    # Small shapes consistent with the module: batch=8, seq=8, hidden=32.
    B, S, H = 8, 8, 32
    key = jax.random.PRNGKey(0)
    k_x, k_w, k_b = jax.random.split(key, 3)

    hidden_states = jax.random.normal(k_x, (B, S, H), dtype=jnp.float32)
    # Deterministic synthetic Linear params (nn.Linear(hidden, hidden) shapes).
    weight = jax.random.normal(k_w, (H, H), dtype=jnp.float32) * 0.05
    bias = jax.random.normal(k_b, (H,), dtype=jnp.float32) * 0.05

    ok = True
    for is_norm in (False, True):
        out = jax.block_until_ready(
            bert_pooler(hidden_states, weight, bias, is_norm)
        )
        ref = bert_pooler_ref(hidden_states, weight, bias, is_norm)
        if not jnp.allclose(out, ref, atol=1e-5, rtol=1e-5):
            ok = False

    if ok:
        print("KERNEL_OK")
</pallas_src>

<mosaic_0001>
module attributes {stable_mosaic.version = 11 : i64} {
  func.func @bert_pooler_kernel(%arg0: i32, %arg1: memref<8x32xf32, #tpu.memory_space<vmem>>, %arg2: memref<32x32xf32, #tpu.memory_space<vmem>>, %arg3: memref<1x32xf32, #tpu.memory_space<vmem>>, %arg4: memref<8x32xf32, #tpu.memory_space<vmem>>) attributes {dimension_semantics = [#tpu.dimension_semantics<parallel>], iteration_bounds = array<i64: 1>, scalar_prefetch = 0 : i64, scratch_operands = 0 : i64, tpu.core_type = #tpu.core_type<tc>, window_params = [{pipeline_mode = #tpu.pipeline_mode<synchronous>, transform_indices = @transform_0, window_bounds = array<i64: 8, 32>}, {transform_indices = @transform_1, window_bounds = array<i64: 32, 32>}, {transform_indices = @transform_2, window_bounds = array<i64: 1, 32>}, {transform_indices = @transform_3, window_bounds = array<i64: 8, 32>}]} {
    %c0 = arith.constant 0 : index
    %c0_0 = arith.constant 0 : index
    %0 = vector.load %arg1[%c0, %c0_0] : memref<8x32xf32, #tpu.memory_space<vmem>>, vector<8x32xf32>
    %c0_1 = arith.constant 0 : index
    %c0_2 = arith.constant 0 : index
    %1 = vector.load %arg2[%c0_1, %c0_2] : memref<32x32xf32, #tpu.memory_space<vmem>>, vector<32x32xf32>
    %cst = arith.constant dense<0.000000e+00> : vector<8x32xf32>
    %2 = tpu.matmul %0, %1, %cst {dimension_numbers = #tpu.dot_dimension_numbers<[1], [1], [0], [0], [0, 0, 1, 0], [], []>} : vector<8x32xf32>, vector<32x32xf32>, vector<8x32xf32> -> vector<8x32xf32>
    %c0_3 = arith.constant 0 : index
    %c0_4 = arith.constant 0 : index
    %3 = vector.load %arg3[%c0_3, %c0_4] : memref<1x32xf32, #tpu.memory_space<vmem>>, vector<1x32xf32>
    %4 = vector.broadcast %3 : vector<1x32xf32> to vector<8x32xf32>
    %5 = arith.addf %2, %4 : vector<8x32xf32>
    %6 = math.tanh %5 : vector<8x32xf32>
    %c0_5 = arith.constant 0 : index
    %c0_6 = arith.constant 0 : index
    %7 = vector.load %arg4[%c0_5, %c0_6] : memref<8x32xf32, #tpu.memory_space<vmem>>, vector<8x32xf32>
    tpu.vector_store %arg4[%c0_5, %c0_6], %6 {strides = array<i32>} : memref<8x32xf32, #tpu.memory_space<vmem>>, vector<8x32xf32>,
    return
  }
  func.func @transform_0(%arg0: i32) -> (i32, i32) {
    %c0_i32 = arith.constant 0 : i32
    %c0_i32_0 = arith.constant 0 : i32
    %c0_i32_1 = arith.constant 0 : i32
    return %c0_i32, %c0_i32_0 : i32, i32
  }
  func.func @transform_1(%arg0: i32) -> (i32, i32) {
    %c0_i32 = arith.constant 0 : i32
    %c0_i32_0 = arith.constant 0 : i32
    return %arg0, %c0_i32 : i32, i32
  }
  func.func @transform_2(%arg0: i32) -> (i32, i32) {
    %c0_i32 = arith.constant 0 : i32
    %c0_i32_0 = arith.constant 0 : i32
    return %c0_i32, %arg0 : i32, i32
  }
  func.func @transform_3(%arg0: i32) -> (i32, i32) {
    %c0_i32 = arith.constant 0 : i32
    %c0_i32_0 = arith.constant 0 : i32
    return %c0_i32, %arg0 : i32, i32
  }
}

</mosaic_0001>

<bundles_post_ra>
// kernel: tpu_custom_call.1
= control target key start
LH: loop header
LB: loop body
LE: loop exit
PB: predicated region body
PF: predicated region fallthrough
CT: control target
= control target key end

     0   :  { %8 = vsyncpa [#allocation3], 0  ;;  %s244_s0 = inlined_call_operand.hbm [shape: f32[8,32], index: 0, kind: input, shape index: {}]   ;;  %s245_s1 = inlined_call_operand.hbm [shape: f32[32,32], index: 1, kind: input, shape index: {}]   ;;  %s246_s2 = inlined_call_operand.vmem [shape: f32[1,32], index: 2, kind: input, shape index: {}]   ;;  %s247_s3 = inlined_call_operand.hbm [shape: f32[8,32], index: 3, kind: output, shape index: {}]  }
   0x1   :  { %9 = vsyncpa [#allocation6], 0 }
   0x2   :  { %10 = vsyncpa [#allocation4], 0  ;;  %s16_s14 = sshll.u32 %s244_s0, 4  ;;  %s201_s15 = smov [#allocation2]   ;;  %s17_s14 = int_to_ptr.hbm [resolvable:$true] %s16_s14 }
   0x3   :  { %s18_s16 = sshll.u32 %s201_s15, 4  ;;  %s26_s19 = sshll.u32 %s245_s1, 4  ;;  %s19_s16 = int_to_ptr.vmem [resolvable:$true] %s18_s16  ;;  %s27_s19 = int_to_ptr.hbm [resolvable:$true] %s26_s19 }
   0x4   :  { %21 = dma.hbm_to_vmem [thread:$0]  %s17_s14, 128, %s19_s16, [#allocation3]  }
   0x5   :  { %s202_s20 = smov [#allocation5]   ;;  %s203_s22 = smov 128  }
   0x6   :  { %s28_s21 = sshll.u32 %s202_s20, 4  ;;  %s204_s23 = smov 8   ;;  %s29_s21 = int_to_ptr.vmem [resolvable:$true] %s28_s21 }
   0x7   :  { %34 = dma.hbm_to_vmem [thread:$0]  %s27_s19, 512, %s29_s21, [#allocation6], %s203_s22, %s203_s22, %s204_s23  }
   0x8   :  { %195 = dma.done.wait [#allocation3], 128  }
   0x9   :  { %196 = vsyncadd [#allocation3], 4294967168 }
   0xa   :  { %197 = dma.done.wait [#allocation6], 512  }
   0xb   :  { %198 = vsyncadd [#allocation6], 4294966784  ;;  %vm54_vm0 = vcmask 261120   ;;  %v49_v0 = vld [vmem:[#allocation5 + $0x18] sm:$0xff]  ;;  %v48_v1 = vld [vmem:[#allocation5 + $0x10] sm:$0xff]  ;;  %s205_s24 = smov [#allocation7]  }
   0xc   :  { %110 = vmatpush.xpose.msk.msra.mxu0 %vm54_vm0, %v49_v0  ;;  %v47_v2 = vld [vmem:[#allocation5 + $0x8] sm:$0xff]  ;;  %v46_v3 = vld [vmem:[#allocation5] sm:$0xff]  ;;  %v45_v4 = vld [vmem:[#allocation2] sm:$0xff]  ;;  %s97_s25 = sshll.u32 %s205_s24, 4  ;;  %s99_s28 = sshll.u32 %s247_s3, 4  ;;  %s98_s25 = int_to_ptr.vmem [resolvable:$true] %s97_s25  ;;  %s100_s28 = int_to_ptr.hbm [resolvable:$true] %s99_s28 }
   0xd   :  { %v120_v5 = vld [vmem:[%s246_s2] ss:$0 sm:$0xff] }
  0x10   :  { %111 = vmatpush.xpose.msk.msra.mxu0 %vm54_vm0, %v48_v1 }
  0x14   :  { %112 = vmatpush.xpose.msk.msra.mxu0 %vm54_vm0, %v47_v2 }
  0x18   :  { %113 = vmatpush.xpose.msk.msra.mxu0 %vm54_vm0, %v46_v3 }
  0x1b   :  { %114 = vmatmul.msk.f32.vlgmr.msra.gmra.mxu0 %vm54_vm0, %v45_v4 }
  0x98   :  { %v87_v6 = vpop.f32.mrf.mxu0 }
  0x99   :  { %v88_v7 = vadd.f32 %v120_v5, %v87_v6 }
  0x9b   :  { %121 = vtanh.f32 %v88_v7 }
  0xa1   :  { %v122_v8 = vpop.eup %121 }
  0xa2   :  { %91 = vst.msk [vmem:[#allocation7] sm:$0xff] %vm54_vm0, %v122_v8 }
  0xa3   :  { %102 = dma.vmem_to_hbm [thread:$0]  %s98_s25, 128, %s100_s28, [#allocation4]  }
  0xa4   :  { %199 = dma.done.wait [#allocation4], 128  }
  0xa5   :  { %200 = vsyncadd [#allocation4], 4294967168 }
  0xa6   :  { %107 = vsyncpa [#allocation3], 1 }
  0xa7   :  { %108 = vsyncpa [#allocation6], 1 }
  0xa8   :  { %109 = vsyncpa [#allocation4], 1 }

</bundles_post_ra>
